<compile_context>
chip_gen: v5e
topology: v5e:2x2
jax: 0.10.0
libtpu: 0.0.40
codegen_flags: <defaults>
</compile_context>

<pallas_src>
from functools import partial

import jax
import jax.numpy as jnp
import numpy as np
from jax.experimental import pallas as pl
from jax.experimental.pallas import tpu as pltpu


# -----------------------------------------------------------------------------
# Pallas kernel: hoisted input projection + unrolled LSTM recurrence + final FC.
#   x_ref    : (T*B, I)  f32, TIME-MAJOR rows (row t*B + b == timestep t, batch b)
#   w_ih_ref : (I, 4H)   bf16, gate columns ordered (i, f, o, g)
#   w_hh_ref : (H, 4H)   bf16, gate columns ordered (i, f, o, g)
#   b_ref    : (1, 4H)   f32,  b_ih + b_hh, columns ordered (i, f, o, g)
#   w_fc_ref : (H, C)    bf16
#   b_fc_ref : (1, C)    f32
#   out_ref  : (B, C)    f32
# -----------------------------------------------------------------------------
def _lstm_fc_kernel(x_ref, w_ih_ref, w_hh_ref, b_ref, w_fc_ref, b_fc_ref,
                    out_ref, *, batch):
    TB, _ = x_ref.shape
    B = batch
    T = TB // B
    H = w_hh_ref.shape[0]          # w_hh_ref is (H, 4H)

    # Recurrent weight loaded once; stays resident in vregs across the unrolled loop.
    w_hh = w_hh_ref[...]           # (H, 4H) bf16

    # --- Input projection for all timesteps in ONE MXU call ------------------
    xg = (jnp.dot(x_ref[...].astype(jnp.bfloat16), w_ih_ref[...],
                  preferred_element_type=jnp.float32)
          + b_ref[...])                                            # (T*B, 4H) f32

    # --- Recurrence: fully unrolled (T is small and static) ------------------
    h = jnp.zeros((B, H), jnp.float32)
    c = jnp.zeros((B, H), jnp.float32)

    for t in range(T):  # static unroll; per-step critical path = 1 matmul + VPU/EUP
        # Time-major layout -> contiguous 2-sublane extraction per step.
        gates = xg[t * B:(t + 1) * B, :] + jnp.dot(
            h.astype(jnp.bfloat16), w_hh,
            preferred_element_type=jnp.float32)                    # (B, 4H) f32
        # Gate columns are pre-permuted to (i, f, o, g): sigmoid only on the
        # first 3H columns, tanh only on the last H (no wasted transcendentals).
        sig = jax.nn.sigmoid(gates[:, :3 * H])
        i_g = sig[:, 0 * H:1 * H]
        f_g = sig[:, 1 * H:2 * H]
        o_g = sig[:, 2 * H:3 * H]
        g_g = jnp.tanh(gates[:, 3 * H:4 * H])
        c = f_g * c + i_g * g_g
        h = o_g * jnp.tanh(c)

    # --- Final Linear on the last hidden state --------------------------------
    # FC weights loaded only AFTER the recurrence (lower vreg pressure in loop).
    out_ref[...] = (jnp.dot(h.astype(jnp.bfloat16), w_fc_ref[...],
                            preferred_element_type=jnp.float32)
                    + b_fc_ref[...])


# -----------------------------------------------------------------------------
# One-time parameter preparation (PyTorch layout -> kernel layout).
#   * row-block permutation (i, f, g, o) -> (i, f, o, g)
#   * transpose weights, fold biases, cast MXU operands to bf16
# Done once at load time, NOT per forward call.
# -----------------------------------------------------------------------------
def _permute_gate_rows(w, H):
    # PyTorch LSTM row blocks (i, f, g, o) -> kernel order (i, f, o, g).
    return jnp.concatenate([w[0:2 * H], w[3 * H:4 * H], w[2 * H:3 * H]], axis=0)


def prepare_params(params):
    H = params["w_hh"].shape[1]          # w_hh is (4H, H) in PyTorch layout
    C = params["w_fc"].shape[0]          # w_fc is (C, H)
    w_ih = _permute_gate_rows(params["w_ih"], H)          # (4H, I)
    w_hh = _permute_gate_rows(params["w_hh"], H)          # (4H, H)
    b = _permute_gate_rows(params["b_ih"] + params["b_hh"], H)   # (4H,)
    return {
        "w_ih_t": jnp.transpose(w_ih).astype(jnp.bfloat16),            # (I, 4H)
        "w_hh_t": jnp.transpose(w_hh).astype(jnp.bfloat16),            # (H, 4H)
        "b_gates": b.reshape(1, 4 * H).astype(jnp.float32),            # (1, 4H)
        "w_fc_t": jnp.transpose(params["w_fc"]).astype(jnp.bfloat16),  # (H, C)
        "b_fc": params["b_fc"].reshape(1, C).astype(jnp.float32),      # (1, C)
    }


# -----------------------------------------------------------------------------
# Wrapper: single grid-less pallas_call, whole problem resident in VMEM.
# -----------------------------------------------------------------------------
def rnn_posture_forward(x, kp):
    """x: (B, T, input_size) float32, batch-first (PyTorch convention).
    kp: output of prepare_params(). Returns logits (B, num_classes) float32."""
    B, T, I = x.shape
    C = kp["w_fc_t"].shape[1]

    # One-time time-major flatten of the tiny (B, T, I) input (1.3 KB): layout
    # plumbing so every unrolled step reads a contiguous 2-sublane slice.
    x_tm = jnp.reshape(jnp.transpose(x.astype(jnp.float32), (1, 0, 2)), (T * B, I))

    vmem = pl.BlockSpec(memory_space=pltpu.MemorySpace.VMEM)
    return pl.pallas_call(
        partial(_lstm_fc_kernel, batch=B),
        out_shape=jax.ShapeDtypeStruct((B, C), jnp.float32),
        in_specs=[vmem] * 6,
        out_specs=vmem,
    )(x_tm, kp["w_ih_t"], kp["w_hh_t"], kp["b_gates"],
      kp["w_fc_t"], kp["b_fc"])
    # TODO(synk): for real deployments, amortize per-call overhead by batching
    # many inference windows in one call (grid over windows, marked "parallel";
    # on v7x that also feeds both TensorCores).


# -----------------------------------------------------------------------------
# Deterministic parameter init (PyTorch-style uniform(-1/sqrt(H), 1/sqrt(H))).
# -----------------------------------------------------------------------------
def init_params(key, input_size=21, hidden_size=64, num_classes=5):
    ks = jax.random.split(key, 6)
    bound = 1.0 / np.sqrt(hidden_size)
    u = lambda k, shape: jax.random.uniform(k, shape, jnp.float32, -bound, bound)
    return {
        "w_ih": u(ks[0], (4 * hidden_size, input_size)),
        "w_hh": u(ks[1], (4 * hidden_size, hidden_size)),
        "b_ih": u(ks[2], (4 * hidden_size,)),
        "b_hh": u(ks[3], (4 * hidden_size,)),
        "w_fc": u(ks[4], (num_classes, hidden_size)),
        "b_fc": u(ks[5], (num_classes,)),
    }


# -----------------------------------------------------------------------------
# Pure-JAX f32 reference for correctness checking (PyTorch gate order i,f,g,o).
# -----------------------------------------------------------------------------
def rnn_posture_reference(x, params):
    w_ih, w_hh, b_ih, b_hh = (params["w_ih"], params["w_hh"],
                              params["b_ih"], params["b_hh"])
    w_fc, b_fc = params["w_fc"], params["b_fc"]
    B, T, _ = x.shape
    H = w_hh.shape[1]
    h = jnp.zeros((B, H), jnp.float32)
    c = jnp.zeros((B, H), jnp.float32)
    for t in range(T):
        gates = x[:, t, :] @ w_ih.T + b_ih + h @ w_hh.T + b_hh
        i_g = jax.nn.sigmoid(gates[:, 0 * H:1 * H])
        f_g = jax.nn.sigmoid(gates[:, 1 * H:2 * H])
        g_g = jnp.tanh(gates[:, 2 * H:3 * H])
        o_g = jax.nn.sigmoid(gates[:, 3 * H:4 * H])
        c = f_g * c + i_g * g_g
        h = o_g * jnp.tanh(c)
    return h @ w_fc.T + b_fc


if __name__ == "__main__":
    key = jax.random.PRNGKey(0)
    k_param, k_x = jax.random.split(key)

    batch, seq_len, input_size = 2, 8, 21
    hidden_size, num_classes = 64, 5

    params = init_params(k_param, input_size, hidden_size, num_classes)
    kparams = prepare_params(params)   # one-time layout / dtype / gate-order prep
    x = jax.random.normal(k_x, (batch, seq_len, input_size), jnp.float32)

    out = rnn_posture_forward(x, kparams)
    out = jax.block_until_ready(out)

    ref = rnn_posture_reference(x, params)
    assert out.shape == (batch, num_classes)
    # Tolerance relaxed vs. a pure-f32 kernel: matmul operands are bf16
    # (f32 accumulation) inside an 8-step recurrence.
    np.testing.assert_allclose(np.asarray(out), np.asarray(ref),
                               rtol=5e-2, atol=5e-2)

    print("KERNEL_OK")
</pallas_src>

<mosaic_0001>
module attributes {stable_mosaic.version = 11 : i64} {
  func.func @_lstm_fc_kernel(%arg0: memref<16x21xf32, #tpu.memory_space<vmem>>, %arg1: memref<21x256xbf16, #tpu.memory_space<vmem>>, %arg2: memref<64x256xbf16, #tpu.memory_space<vmem>>, %arg3: memref<1x256xf32, #tpu.memory_space<vmem>>, %arg4: memref<64x5xbf16, #tpu.memory_space<vmem>>, %arg5: memref<1x5xf32, #tpu.memory_space<vmem>>, %arg6: memref<2x5xf32, #tpu.memory_space<vmem>>) attributes {dimension_semantics = [], scalar_prefetch = 0 : i64, scratch_operands = 0 : i64, tpu.core_type = #tpu.core_type<tc>} {
    %c0 = arith.constant 0 : index
    %c0_0 = arith.constant 0 : index
    %0 = vector.load %arg2[%c0, %c0_0] : memref<64x256xbf16, #tpu.memory_space<vmem>>, vector<64x256xbf16>
    %c0_1 = arith.constant 0 : index
    %c0_2 = arith.constant 0 : index
    %1 = vector.load %arg0[%c0_1, %c0_2] : memref<16x21xf32, #tpu.memory_space<vmem>>, vector<16x21xf32>
    %2 = arith.truncf %1 : vector<16x21xf32> to vector<16x21xbf16>
    %c0_3 = arith.constant 0 : index
    %c0_4 = arith.constant 0 : index
    %3 = vector.load %arg1[%c0_3, %c0_4] : memref<21x256xbf16, #tpu.memory_space<vmem>>, vector<21x256xbf16>
    %cst = arith.constant dense<0.000000e+00> : vector<16x256xf32>
    %4 = tpu.matmul %2, %3, %cst {dimension_numbers = #tpu.dot_dimension_numbers<[1], [0], [0], [1], [0, 0, 1, 1], [], []>} : vector<16x21xbf16>, vector<21x256xbf16>, vector<16x256xf32> -> vector<16x256xf32>
    %c0_5 = arith.constant 0 : index
    %c0_6 = arith.constant 0 : index
    %5 = vector.load %arg3[%c0_5, %c0_6] : memref<1x256xf32, #tpu.memory_space<vmem>>, vector<1x256xf32>
    %6 = vector.broadcast %5 : vector<1x256xf32> to vector<16x256xf32>
    %7 = arith.addf %4, %6 : vector<16x256xf32>
    %cst_7 = arith.constant 0.000000e+00 : f32
    %8 = vector.broadcast %cst_7 : f32 to vector<2x64xf32>
    %cst_8 = arith.constant 0.000000e+00 : f32
    %9 = vector.broadcast %cst_8 : f32 to vector<2x64xf32>
    %10 = vector.extract_strided_slice %7 {offsets = [0, 0], sizes = [2, 256], strides = [1, 1]} : vector<16x256xf32> to vector<2x256xf32>
    %11 = arith.truncf %8 : vector<2x64xf32> to vector<2x64xbf16>
    %cst_9 = arith.constant dense<0.000000e+00> : vector<2x256xf32>
    %12 = tpu.matmul %11, %0, %cst_9 {dimension_numbers = #tpu.dot_dimension_numbers<[1], [0], [0], [1], [0, 0, 1, 1], [], []>} : vector<2x64xbf16>, vector<64x256xbf16>, vector<2x256xf32> -> vector<2x256xf32>
    %13 = arith.addf %10, %12 : vector<2x256xf32>
    %14 = vector.extract_strided_slice %13 {offsets = [0, 0], sizes = [2, 192], strides = [1, 1]} : vector<2x256xf32> to vector<2x192xf32>
    %15 = arith.negf %14 : vector<2x192xf32>
    %16 = math.exp %15 : vector<2x192xf32>
    %cst_10 = arith.constant 1.000000e+00 : f32
    %17 = vector.broadcast %cst_10 : f32 to vector<2x192xf32>
    %18 = arith.addf %17, %16 : vector<2x192xf32>
    %19 = arith.divf %17, %18 : vector<2x192xf32>
    %20 = vector.extract_strided_slice %19 {offsets = [0, 0], sizes = [2, 64], strides = [1, 1]} : vector<2x192xf32> to vector<2x64xf32>
    %21 = vector.extract_strided_slice %19 {offsets = [0, 64], sizes = [2, 64], strides = [1, 1]} : vector<2x192xf32> to vector<2x64xf32>
    %22 = vector.extract_strided_slice %19 {offsets = [0, 128], sizes = [2, 64], strides = [1, 1]} : vector<2x192xf32> to vector<2x64xf32>
    %23 = vector.extract_strided_slice %13 {offsets = [0, 192], sizes = [2, 64], strides = [1, 1]} : vector<2x256xf32> to vector<2x64xf32>
    %24 = math.tanh %23 : vector<2x64xf32>
    %25 = arith.mulf %21, %9 : vector<2x64xf32>
    %26 = arith.mulf %20, %24 : vector<2x64xf32>
    %27 = arith.addf %25, %26 : vector<2x64xf32>
    %28 = math.tanh %27 : vector<2x64xf32>
    %29 = arith.mulf %22, %28 : vector<2x64xf32>
    %30 = vector.extract_strided_slice %7 {offsets = [2, 0], sizes = [2, 256], strides = [1, 1]} : vector<16x256xf32> to vector<2x256xf32>
    %31 = arith.truncf %29 : vector<2x64xf32> to vector<2x64xbf16>
    %cst_11 = arith.constant dense<0.000000e+00> : vector<2x256xf32>
    %32 = tpu.matmul %31, %0, %cst_11 {dimension_numbers = #tpu.dot_dimension_numbers<[1], [0], [0], [1], [0, 0, 1, 1], [], []>} : vector<2x64xbf16>, vector<64x256xbf16>, vector<2x256xf32> -> vector<2x256xf32>
    %33 = arith.addf %30, %32 : vector<2x256xf32>
    %34 = vector.extract_strided_slice %33 {offsets = [0, 0], sizes = [2, 192], strides = [1, 1]} : vector<2x256xf32> to vector<2x192xf32>
    %35 = arith.negf %34 : vector<2x192xf32>
    %36 = math.exp %35 : vector<2x192xf32>
    %cst_12 = arith.constant 1.000000e+00 : f32
    %37 = vector.broadcast %cst_12 : f32 to vector<2x192xf32>
    %38 = arith.addf %37, %36 : vector<2x192xf32>
    %39 = arith.divf %37, %38 : vector<2x192xf32>
    %40 = vector.extract_strided_slice %39 {offsets = [0, 0], sizes = [2, 64], strides = [1, 1]} : vector<2x192xf32> to vector<2x64xf32>
    %41 = vector.extract_strided_slice %39 {offsets = [0, 64], sizes = [2, 64], strides = [1, 1]} : vector<2x192xf32> to vector<2x64xf32>
    %42 = vector.extract_strided_slice %39 {offsets = [0, 128], sizes = [2, 64], strides = [1, 1]} : vector<2x192xf32> to vector<2x64xf32>
    %43 = vector.extract_strided_slice %33 {offsets = [0, 192], sizes = [2, 64], strides = [1, 1]} : vector<2x256xf32> to vector<2x64xf32>
    %44 = math.tanh %43 : vector<2x64xf32>
    %45 = arith.mulf %41, %27 : vector<2x64xf32>
    %46 = arith.mulf %40, %44 : vector<2x64xf32>
    %47 = arith.addf %45, %46 : vector<2x64xf32>
    %48 = math.tanh %47 : vector<2x64xf32>
    %49 = arith.mulf %42, %48 : vector<2x64xf32>
    %50 = vector.extract_strided_slice %7 {offsets = [4, 0], sizes = [2, 256], strides = [1, 1]} : vector<16x256xf32> to vector<2x256xf32>
    %51 = arith.truncf %49 : vector<2x64xf32> to vector<2x64xbf16>
    %cst_13 = arith.constant dense<0.000000e+00> : vector<2x256xf32>
    %52 = tpu.matmul %51, %0, %cst_13 {dimension_numbers = #tpu.dot_dimension_numbers<[1], [0], [0], [1], [0, 0, 1, 1], [], []>} : vector<2x64xbf16>, vector<64x256xbf16>, vector<2x256xf32> -> vector<2x256xf32>
    %53 = arith.addf %50, %52 : vector<2x256xf32>
    %54 = vector.extract_strided_slice %53 {offsets = [0, 0], sizes = [2, 192], strides = [1, 1]} : vector<2x256xf32> to vector<2x192xf32>
    %55 = arith.negf %54 : vector<2x192xf32>
    %56 = math.exp %55 : vector<2x192xf32>
    %cst_14 = arith.constant 1.000000e+00 : f32
    %57 = vector.broadcast %cst_14 : f32 to vector<2x192xf32>
    %58 = arith.addf %57, %56 : vector<2x192xf32>
    %59 = arith.divf %57, %58 : vector<2x192xf32>
    %60 = vector.extract_strided_slice %59 {offsets = [0, 0], sizes = [2, 64], strides = [1, 1]} : vector<2x192xf32> to vector<2x64xf32>
    %61 = vector.extract_strided_slice %59 {offsets = [0, 64], sizes = [2, 64], strides = [1, 1]} : vector<2x192xf32> to vector<2x64xf32>
    %62 = vector.extract_strided_slice %59 {offsets = [0, 128], sizes = [2, 64], strides = [1, 1]} : vector<2x192xf32> to vector<2x64xf32>
    %63 = vector.extract_strided_slice %53 {offsets = [0, 192], sizes = [2, 64], strides = [1, 1]} : vector<2x256xf32> to vector<2x64xf32>
    %64 = math.tanh %63 : vector<2x64xf32>
    %65 = arith.mulf %61, %47 : vector<2x64xf32>
    %66 = arith.mulf %60, %64 : vector<2x64xf32>
    %67 = arith.addf %65, %66 : vector<2x64xf32>
    %68 = math.tanh %67 : vector<2x64xf32>
    %69 = arith.mulf %62, %68 : vector<2x64xf32>
    %70 = vector.extract_strided_slice %7 {offsets = [6, 0], sizes = [2, 256], strides = [1, 1]} : vector<16x256xf32> to vector<2x256xf32>
    %71 = arith.truncf %69 : vector<2x64xf32> to vector<2x64xbf16>
    %cst_15 = arith.constant dense<0.000000e+00> : vector<2x256xf32>
    %72 = tpu.matmul %71, %0, %cst_15 {dimension_numbers = #tpu.dot_dimension_numbers<[1], [0], [0], [1], [0, 0, 1, 1], [], []>} : vector<2x64xbf16>, vector<64x256xbf16>, vector<2x256xf32> -> vector<2x256xf32>
    %73 = arith.addf %70, %72 : vector<2x256xf32>
    %74 = vector.extract_strided_slice %73 {offsets = [0, 0], sizes = [2, 192], strides = [1, 1]} : vector<2x256xf32> to vector<2x192xf32>
    %75 = arith.negf %74 : vector<2x192xf32>
    %76 = math.exp %75 : vector<2x192xf32>
    %cst_16 = arith.constant 1.000000e+00 : f32
    %77 = vector.broadcast %cst_16 : f32 to vector<2x192xf32>
    %78 = arith.addf %77, %76 : vector<2x192xf32>
    %79 = arith.divf %77, %78 : vector<2x192xf32>
    %80 = vector.extract_strided_slice %79 {offsets = [0, 0], sizes = [2, 64], strides = [1, 1]} : vector<2x192xf32> to vector<2x64xf32>
    %81 = vector.extract_strided_slice %79 {offsets = [0, 64], sizes = [2, 64], strides = [1, 1]} : vector<2x192xf32> to vector<2x64xf32>
    %82 = vector.extract_strided_slice %79 {offsets = [0, 128], sizes = [2, 64], strides = [1, 1]} : vector<2x192xf32> to vector<2x64xf32>
    %83 = vector.extract_strided_slice %73 {offsets = [0, 192], sizes = [2, 64], strides = [1, 1]} : vector<2x256xf32> to vector<2x64xf32>
    %84 = math.tanh %83 : vector<2x64xf32>
    %85 = arith.mulf %81, %67 : vector<2x64xf32>
    %86 = arith.mulf %80, %84 : vector<2x64xf32>
    %87 = arith.addf %85, %86 : vector<2x64xf32>
    %88 = math.tanh %87 : vector<2x64xf32>
    %89 = arith.mulf %82, %88 : vector<2x64xf32>
    %90 = vector.extract_strided_slice %7 {offsets = [8, 0], sizes = [2, 256], strides = [1, 1]} : vector<16x256xf32> to vector<2x256xf32>
    %91 = arith.truncf %89 : vector<2x64xf32> to vector<2x64xbf16>
    %cst_17 = arith.constant dense<0.000000e+00> : vector<2x256xf32>
    %92 = tpu.matmul %91, %0, %cst_17 {dimension_numbers = #tpu.dot_dimension_numbers<[1], [0], [0], [1], [0, 0, 1, 1], [], []>} : vector<2x64xbf16>, vector<64x256xbf16>, vector<2x256xf32> -> vector<2x256xf32>
    %93 = arith.addf %90, %92 : vector<2x256xf32>
    %94 = vector.extract_strided_slice %93 {offsets = [0, 0], sizes = [2, 192], strides = [1, 1]} : vector<2x256xf32> to vector<2x192xf32>
    %95 = arith.negf %94 : vector<2x192xf32>
    %96 = math.exp %95 : vector<2x192xf32>
    %cst_18 = arith.constant 1.000000e+00 : f32
    %97 = vector.broadcast %cst_18 : f32 to vector<2x192xf32>
    %98 = arith.addf %97, %96 : vector<2x192xf32>
    %99 = arith.divf %97, %98 : vector<2x192xf32>
    %100 = vector.extract_strided_slice %99 {offsets = [0, 0], sizes = [2, 64], strides = [1, 1]} : vector<2x192xf32> to vector<2x64xf32>
    %101 = vector.extract_strided_slice %99 {offsets = [0, 64], sizes = [2, 64], strides = [1, 1]} : vector<2x192xf32> to vector<2x64xf32>
    %102 = vector.extract_strided_slice %99 {offsets = [0, 128], sizes = [2, 64], strides = [1, 1]} : vector<2x192xf32> to vector<2x64xf32>
    %103 = vector.extract_strided_slice %93 {offsets = [0, 192], sizes = [2, 64], strides = [1, 1]} : vector<2x256xf32> to vector<2x64xf32>
    %104 = math.tanh %103 : vector<2x64xf32>
    %105 = arith.mulf %101, %87 : vector<2x64xf32>
    %106 = arith.mulf %100, %104 : vector<2x64xf32>
    %107 = arith.addf %105, %106 : vector<2x64xf32>
    %108 = math.tanh %107 : vector<2x64xf32>
    %109 = arith.mulf %102, %108 : vector<2x64xf32>
    %110 = vector.extract_strided_slice %7 {offsets = [10, 0], sizes = [2, 256], strides = [1, 1]} : vector<16x256xf32> to vector<2x256xf32>
    %111 = arith.truncf %109 : vector<2x64xf32> to vector<2x64xbf16>
    %cst_19 = arith.constant dense<0.000000e+00> : vector<2x256xf32>
    %112 = tpu.matmul %111, %0, %cst_19 {dimension_numbers = #tpu.dot_dimension_numbers<[1], [0], [0], [1], [0, 0, 1, 1], [], []>} : vector<2x64xbf16>, vector<64x256xbf16>, vector<2x256xf32> -> vector<2x256xf32>
    %113 = arith.addf %110, %112 : vector<2x256xf32>
    %114 = vector.extract_strided_slice %113 {offsets = [0, 0], sizes = [2, 192], strides = [1, 1]} : vector<2x256xf32> to vector<2x192xf32>
    %115 = arith.negf %114 : vector<2x192xf32>
    %116 = math.exp %115 : vector<2x192xf32>
    %cst_20 = arith.constant 1.000000e+00 : f32
    %117 = vector.broadcast %cst_20 : f32 to vector<2x192xf32>
    %118 = arith.addf %117, %116 : vector<2x192xf32>
    %119 = arith.divf %117, %118 : vector<2x192xf32>
    %120 = vector.extract_strided_slice %119 {offsets = [0, 0], sizes = [2, 64], strides = [1, 1]} : vector<2x192xf32> to vector<2x64xf32>
    %121 = vector.extract_strided_slice %119 {offsets = [0, 64], sizes = [2, 64], strides = [1, 1]} : vector<2x192xf32> to vector<2x64xf32>
    %122 = vector.extract_strided_slice %119 {offsets = [0, 128], sizes = [2, 64], strides = [1, 1]} : vector<2x192xf32> to vector<2x64xf32>
    %123 = vector.extract_strided_slice %113 {offsets = [0, 192], sizes = [2, 64], strides = [1, 1]} : vector<2x256xf32> to vector<2x64xf32>
    %124 = math.tanh %123 : vector<2x64xf32>
    %125 = arith.mulf %121, %107 : vector<2x64xf32>
    %126 = arith.mulf %120, %124 : vector<2x64xf32>
    %127 = arith.addf %125, %126 : vector<2x64xf32>
    %128 = math.tanh %127 : vector<2x64xf32>
    %129 = arith.mulf %122, %128 : vector<2x64xf32>
    %130 = vector.extract_strided_slice %7 {offsets = [12, 0], sizes = [2, 256], strides = [1, 1]} : vector<16x256xf32> to vector<2x256xf32>
    %131 = arith.truncf %129 : vector<2x64xf32> to vector<2x64xbf16>
    %cst_21 = arith.constant dense<0.000000e+00> : vector<2x256xf32>
    %132 = tpu.matmul %131, %0, %cst_21 {dimension_numbers = #tpu.dot_dimension_numbers<[1], [0], [0], [1], [0, 0, 1, 1], [], []>} : vector<2x64xbf16>, vector<64x256xbf16>, vector<2x256xf32> -> vector<2x256xf32>
    %133 = arith.addf %130, %132 : vector<2x256xf32>
    %134 = vector.extract_strided_slice %133 {offsets = [0, 0], sizes = [2, 192], strides = [1, 1]} : vector<2x256xf32> to vector<2x192xf32>
    %135 = arith.negf %134 : vector<2x192xf32>
    %136 = math.exp %135 : vector<2x192xf32>
    %cst_22 = arith.constant 1.000000e+00 : f32
    %137 = vector.broadcast %cst_22 : f32 to vector<2x192xf32>
    %138 = arith.addf %137, %136 : vector<2x192xf32>
    %139 = arith.divf %137, %138 : vector<2x192xf32>
    %140 = vector.extract_strided_slice %139 {offsets = [0, 0], sizes = [2, 64], strides = [1, 1]} : vector<2x192xf32> to vector<2x64xf32>
    %141 = vector.extract_strided_slice %139 {offsets = [0, 64], sizes = [2, 64], strides = [1, 1]} : vector<2x192xf32> to vector<2x64xf32>
    %142 = vector.extract_strided_slice %139 {offsets = [0, 128], sizes = [2, 64], strides = [1, 1]} : vector<2x192xf32> to vector<2x64xf32>
    %143 = vector.extract_strided_slice %133 {offsets = [0, 192], sizes = [2, 64], strides = [1, 1]} : vector<2x256xf32> to vector<2x64xf32>
    %144 = math.tanh %143 : vector<2x64xf32>
    %145 = arith.mulf %141, %127 : vector<2x64xf32>
    %146 = arith.mulf %140, %144 : vector<2x64xf32>
    %147 = arith.addf %145, %146 : vector<2x64xf32>
    %148 = math.tanh %147 : vector<2x64xf32>
    %149 = arith.mulf %142, %148 : vector<2x64xf32>
    %150 = vector.extract_strided_slice %7 {offsets = [14, 0], sizes = [2, 256], strides = [1, 1]} : vector<16x256xf32> to vector<2x256xf32>
    %151 = arith.truncf %149 : vector<2x64xf32> to vector<2x64xbf16>
    %cst_23 = arith.constant dense<0.000000e+00> : vector<2x256xf32>
    %152 = tpu.matmul %151, %0, %cst_23 {dimension_numbers = #tpu.dot_dimension_numbers<[1], [0], [0], [1], [0, 0, 1, 1], [], []>} : vector<2x64xbf16>, vector<64x256xbf16>, vector<2x256xf32> -> vector<2x256xf32>
    %153 = arith.addf %150, %152 : vector<2x256xf32>
    %154 = vector.extract_strided_slice %153 {offsets = [0, 0], sizes = [2, 192], strides = [1, 1]} : vector<2x256xf32> to vector<2x192xf32>
    %155 = arith.negf %154 : vector<2x192xf32>
    %156 = math.exp %155 : vector<2x192xf32>
    %cst_24 = arith.constant 1.000000e+00 : f32
    %157 = vector.broadcast %cst_24 : f32 to vector<2x192xf32>
    %158 = arith.addf %157, %156 : vector<2x192xf32>
    %159 = arith.divf %157, %158 : vector<2x192xf32>
    %160 = vector.extract_strided_slice %159 {offsets = [0, 0], sizes = [2, 64], strides = [1, 1]} : vector<2x192xf32> to vector<2x64xf32>
    %161 = vector.extract_strided_slice %159 {offsets = [0, 64], sizes = [2, 64], strides = [1, 1]} : vector<2x192xf32> to vector<2x64xf32>
    %162 = vector.extract_strided_slice %159 {offsets = [0, 128], sizes = [2, 64], strides = [1, 1]} : vector<2x192xf32> to vector<2x64xf32>
    %163 = vector.extract_strided_slice %153 {offsets = [0, 192], sizes = [2, 64], strides = [1, 1]} : vector<2x256xf32> to vector<2x64xf32>
    %164 = math.tanh %163 : vector<2x64xf32>
    %165 = arith.mulf %161, %147 : vector<2x64xf32>
    %166 = arith.mulf %160, %164 : vector<2x64xf32>
    %167 = arith.addf %165, %166 : vector<2x64xf32>
    %168 = math.tanh %167 : vector<2x64xf32>
    %169 = arith.mulf %162, %168 : vector<2x64xf32>
    %170 = arith.truncf %169 : vector<2x64xf32> to vector<2x64xbf16>
    %c0_25 = arith.constant 0 : index
    %c0_26 = arith.constant 0 : index
    %171 = vector.load %arg4[%c0_25, %c0_26] : memref<64x5xbf16, #tpu.memory_space<vmem>>, vector<64x5xbf16>
    %cst_27 = arith.constant dense<0.000000e+00> : vector<2x5xf32>
    %172 = tpu.matmul %170, %171, %cst_27 {dimension_numbers = #tpu.dot_dimension_numbers<[1], [0], [0], [1], [0, 0, 1, 1], [], []>} : vector<2x64xbf16>, vector<64x5xbf16>, vector<2x5xf32> -> vector<2x5xf32>
    %c0_28 = arith.constant 0 : index
    %c0_29 = arith.constant 0 : index
    %173 = vector.load %arg5[%c0_28, %c0_29] : memref<1x5xf32, #tpu.memory_space<vmem>>, vector<1x5xf32>
    %174 = vector.broadcast %173 : vector<1x5xf32> to vector<2x5xf32>
    %175 = arith.addf %172, %174 : vector<2x5xf32>
    %c0_30 = arith.constant 0 : index
    %c0_31 = arith.constant 0 : index
    %176 = vector.load %arg6[%c0_30, %c0_31] : memref<2x5xf32, #tpu.memory_space<vmem>>, vector<2x5xf32>
    tpu.vector_store %arg6[%c0_30, %c0_31], %175 {strides = array<i32>} : memref<2x5xf32, #tpu.memory_space<vmem>>, vector<2x5xf32>,
    return
  }
}

</mosaic_0001>

<bundles_post_ra>
// kernel: tpu_custom_call.1
= control target key start
LH: loop header
LB: loop body
LE: loop exit
PB: predicated region body
PF: predicated region fallthrough
CT: control target
= control target key end

     0   :  { %11 = vsyncpa [#allocation3], 0  ;;  %s1580_s0 = inlined_call_operand.hbm [shape: f32[16,21], index: 0, kind: input, shape index: {}]   ;;  %s1581_s1 = inlined_call_operand.vmem [shape: bf16[21,256], index: 1, kind: input, shape index: {}]   ;;  %s1582_s2 = inlined_call_operand.hbm [shape: bf16[64,256], index: 2, kind: input, shape index: {}]   ;;  %s1583_s3 = inlined_call_operand.vmem [shape: f32[1,256], index: 3, kind: input, shape index: {}]   ;;  %s1584_s4 = inlined_call_operand.vmem [shape: bf16[64,5], index: 4, kind: input, shape index: {}]   ;;  %s1585_s5 = inlined_call_operand.vmem [shape: f32[1,5], index: 5, kind: input, shape index: {}]   ;;  %s1586_s6 = inlined_call_operand.hbm [shape: f32[2,5], index: 6, kind: output, shape index: {}]  }
   0x1   :  { %12 = vsyncpa [#allocation6], 0 }
   0x2   :  { %13 = vsyncpa [#allocation4], 0  ;;  %s18_s23 = sshll.u32 %s1580_s0, 4  ;;  %s1306_s24 = smov [#allocation2]   ;;  %s19_s23 = int_to_ptr.hbm [resolvable:$true] %s18_s23 }
   0x3   :  { %s20_s25 = sshll.u32 %s1306_s24, 4  ;;  %s33_s28 = sshll.u32 %s1582_s2, 4  ;;  %s21_s25 = int_to_ptr.vmem [resolvable:$true] %s20_s25  ;;  %s34_s28 = int_to_ptr.hbm [resolvable:$true] %s33_s28 }
   0x4   :  { %s1307_s29 = smov 128   ;;  %s1308_s30 = smov 8  }
   0x5   :  { %26 = dma.hbm_to_vmem [thread:$0]  %s19_s23, 256, %s21_s25, [#allocation3], %s1307_s29, %s1307_s29, %s1308_s30  }
   0x6   :  { %s1309_s7 = smov [#allocation5]  }
   0x7   :  { %s35_s8 = sshll.u32 %s1309_s7, 4  ;;  %s36_s8 = int_to_ptr.vmem [resolvable:$true] %s35_s8 }
   0x8   :  { %41 = dma.hbm_to_vmem [thread:$0]  %s34_s28, 1024, %s36_s8, [#allocation6], %s1307_s29, %s1307_s29, %s1308_s30  }
   0x9   :  { %1300 = dma.done.wait [#allocation3], 256  }
   0xa   :  { %1301 = vsyncadd [#allocation3], 4294967040 }
   0xb   :  { %1302 = dma.done.wait [#allocation6], 1024  }
   0xc   :  { %1303 = vsyncadd [#allocation6], 4294966272  ;;  %vm96_vm0 = vcmask 1041408   ;;  %vm97_vm1 = vcmask 1042432   ;;  %v1310_v0 = vmov 65535   ;;  %v65_v25 = vld [vmem:[#allocation2] sm:$0xff] }
   0xd   :  { %v98_v1 = vsel %vm96_vm0, 4294967295, %v1310_v0  ;;  %v1115_v2 = vld [vmem:[#allocation5 + $0x34] sm:$0xf]  ;;  %v1058_v3 = vld [vmem:[#allocation5 + $0x38] sm:$0xf0]  ;;  %vm92_vm2 = vcmask 171008  }
   0xe   :  { %v70_v4 = vld [vmem:[%s1581_s1 + $0x10] sm:$0x77]  ;;  %v1358_v5 = vor.u32 %v1115_v2, %v1058_v3  ;;  %v1050_v8 = vld [vmem:[#allocation5 + $0x28] sm:$0xf0]  ;;  %v99_v10 = vsel %vm97_vm1, %v98_v1, 0  ;;  %v66_v28 = vld [vmem:[#allocation2 + $0x8] sm:$0xff] }
   0xf   :  { %v85_v6 = vunpack.c.h.b16 %v70_v4  ;;  %v1113_v7 = vld [vmem:[#allocation5 + $0x24] sm:$0xf]  ;;  %v84_v9 = vunpack.c.l.b16 %v70_v4  ;;  %v1117_v13 = vld [vmem:[%s1581_s1 + $0x4] sm:$0xf]  ;;  %v1024_v14 = vld [vmem:[%s1581_s1 + $0x8] sm:$0xf0]  ;;  %v67_v37 = vpack.c.bf16 %v66_v28, %v65_v25 }
  0x10   :  { %195 = vmatpush.bf16.msra.mxu3 %v1358_v5  ;;  %v1361_v12 = vor.u32 %v1113_v7, %v1050_v8  ;;  %v1111_v15 = vld [vmem:[#allocation5 + $0x14] sm:$0xf]  ;;  %v1042_v17 = vld [vmem:[#allocation5 + $0x18] sm:$0xf0]  ;;  %v1056_v18 = vld [vmem:[#allocation5 + $0x30] sm:$0xf]  ;;  %v1027_v26 = vor.u32 %v1117_v13, %v1024_v14 }
  0x11   :  { %v89_v11 = vpack.c.b16 %v85_v6, %v85_v6  ;;  %v88_v16 = vpack.c.b16 %v84_v9, %v84_v9  ;;  %v1116_v19 = vld [vmem:[#allocation5 + $0x34] sm:$0xf0]  ;;  %v1048_v22 = vld [vmem:[#allocation5 + $0x20] sm:$0xf]  ;;  %v1114_v23 = vld [vmem:[#allocation5 + $0x24] sm:$0xf0]  ;;  %v1372_v27 = vor.u32 %v1111_v15, %v1042_v17 }
  0x12   :  { %v1369_v21 = vor.u32 %v1116_v19, %v1056_v18  ;;  %v1022_v29 = vld [vmem:[%s1581_s1] sm:$0xf]  ;;  %v1118_v30 = vld [vmem:[%s1581_s1 + $0x4] sm:$0xf0]  ;;  %v1109_v31 = vld [vmem:[#allocation5 + $0x4] sm:$0xf]  ;;  %v1381_v33 = vor.u32 %v1114_v23, %v1048_v22 }
  0x13   :  { %v104_v20 = vand.u32 %v99_v10, %v89_v11  ;;  %v101_v24 = vand.u32 %v99_v10, %v88_v16  ;;  %v1034_v32 = vld [vmem:[#allocation5 + $0x8] sm:$0xf0]  ;;  %v1023_v34 = vor.u32 %v1118_v30, %v1022_v29  ;;  %v1040_v35 = vld [vmem:[#allocation5 + $0x10] sm:$0xf]  ;;  %v1112_v36 = vld [vmem:[#allocation5 + $0x14] sm:$0xf0] }
  0x14   :  { %196 = vmatpush.bf16.msra.mxu3 %v1361_v12  ;;  %182 = vmatpush.bf16.msra.mxu2 %v1369_v21  ;;  %v1384_v38 = vor.u32 %v1109_v31, %v1034_v32  ;;  %v1387_v39 = vor.u32 %v1112_v36, %v1040_v35  ;;  %v1032_v40 = vld [vmem:[#allocation5] sm:$0xf]  ;;  %v1110_v41 = vld [vmem:[#allocation5 + $0x4] sm:$0xf0]  ;;  %v1311_v43 = vmov 0   ;;  %s1312_s18 = smov 64  }
  0x15   :  { %126 = vmatpush.bf16.msra.mxu1 %v104_v20  ;;  %112 = vmatpush.bf16.msra.mxu0 %v101_v24  ;;  %v1393_v42 = vor.u32 %v1110_v41, %v1032_v40  ;;  %v1429_v44 = vld [vmem:[%s1583_s3] sm:$0x3]  ;;  %vm174_vm11 = vcmask 523264   ;;  %s1313_s27 = smov [#allocation7]   ;;  %s1009_s7 = sshll.u32 %s1586_s6, 4  ;;  %s1010_s7 = int_to_ptr.hbm [resolvable:$true] %s1009_s7 }
  0x16   :  { %v74_v45 = vperm.slane %v1429_v44, 1  ;;  %v73_v54 = vperm.slane %v1429_v44, 0  ;;  %s1007_s28 = sshll.u32 %s1313_s27, 4  ;;  %s1008_s28 = int_to_ptr.vmem [resolvable:$true] %s1007_s28 }
  0x18   :  { %197 = vmatpush.bf16.msra.mxu3 %v1372_v27  ;;  %183 = vmatpush.bf16.msra.mxu2 %v1381_v33 }
  0x19   :  { %127 = vmatpush.bf16.msra.mxu1 %v1027_v26  ;;  %113 = vmatpush.bf16.msra.mxu0 %v1023_v34 }
  0x1c   :  { %1029 = vmatmul.msk.bf16.vlgmr.msra.gmra.mxu1 %vm92_vm2, %v67_v37  ;;  %198 = vmatpush.bf16.msra.mxu3 %v1384_v38 }
  0x1d   :  { %283 = vmatpush.bf16.msrb.mxu1 %v1358_v5  ;;  %270 = vmatpush.bf16.msrb.mxu0 %v1369_v21 }
  0x1e   :  { %1028 = vmatmul.msk.bf16.vlgmr.msra.gmra.mxu0 %vm92_vm2, %v67_v37  ;;  %184 = vmatpush.bf16.msra.mxu2 %v1387_v39 }
  0x1f   :  { %199 = vmatmul.bf16.vlgmr.msra.gmra.mxu3 %v1311_v43 }
  0x20   :  { %382 = vmatpush.bf16.msrb.mxu3 %v1358_v5 }
  0x21   :  { %284 = vmatpush.bf16.msrb.mxu1 %v1361_v12  ;;  %271 = vmatpush.bf16.msrb.mxu0 %v1381_v33 }
  0x22   :  { %185 = vmatpush.bf16.msra.mxu2 %v1393_v42 }
  0x24   :  { %383 = vmatpush.bf16.msrb.mxu3 %v1361_v12 }
  0x25   :  { %285 = vmatpush.bf16.msrb.mxu1 %v1372_v27  ;;  %272 = vmatpush.bf16.msrb.mxu0 %v1387_v39 }
  0x26   :  { %369 = vmatpush.bf16.msrb.mxu2 %v1369_v21 }
  0x27   :  { %186 = vmatmul.bf16.vlgmr.msra.gmra.mxu2 %v1311_v43 }
  0x28   :  { %384 = vmatpush.bf16.msrb.mxu3 %v1372_v27 }
  0x29   :  { %286 = vmatpush.bf16.msrb.mxu1 %v1384_v38  ;;  %273 = vmatpush.bf16.msrb.mxu0 %v1393_v42 }
  0x2a   :  { %370 = vmatpush.bf16.msrb.mxu2 %v1381_v33 }
  0x2c   :  { %385 = vmatpush.bf16.msrb.mxu3 %v1384_v38 }
  0x2d   :  { %481 = vmatpush.bf16.msra.mxu1 %v1358_v5  ;;  %468 = vmatpush.bf16.msra.mxu0 %v1369_v21 }
  0x2e   :  { %371 = vmatpush.bf16.msrb.mxu2 %v1387_v39 }
  0x30   :  { %580 = vmatpush.bf16.msra.mxu3 %v1358_v5 }
  0x31   :  { %482 = vmatpush.bf16.msra.mxu1 %v1361_v12  ;;  %469 = vmatpush.bf16.msra.mxu0 %v1381_v33 }
  0x32   :  { %372 = vmatpush.bf16.msrb.mxu2 %v1393_v42 }
  0x34   :  { %581 = vmatpush.bf16.msra.mxu3 %v1361_v12 }
  0x35   :  { %483 = vmatpush.bf16.msra.mxu1 %v1372_v27  ;;  %470 = vmatpush.bf16.msra.mxu0 %v1387_v39 }
  0x36   :  { %567 = vmatpush.bf16.msra.mxu2 %v1369_v21 }
  0x38   :  { %582 = vmatpush.bf16.msra.mxu3 %v1372_v27 }
  0x39   :  { %484 = vmatpush.bf16.msra.mxu1 %v1384_v38  ;;  %471 = vmatpush.bf16.msra.mxu0 %v1393_v42 }
  0x3a   :  { %568 = vmatpush.bf16.msra.mxu2 %v1381_v33 }
  0x3c   :  { %583 = vmatpush.bf16.msra.mxu3 %v1384_v38 }
  0x3e   :  { %569 = vmatpush.bf16.msra.mxu2 %v1387_v39 }
  0x42   :  { %570 = vmatpush.bf16.msra.mxu2 %v1393_v42 }
  0x99   :  { %v129_v46 = vpop.f32.mrf.mxu1 }
  0x9a   :  { %v1434_v47 = vadd.f32 %v129_v46, %v74_v45 }
  0x9b   :  { %v115_v55 = vpop.f32.mrf.mxu0 }
  0x9c   :  { %v1441_v56 = vadd.f32 %v115_v55, %v73_v54 }
  0xa1   :  { %v1459_v34 = vpop.f32.mrf.mxu1 }
  0xa2   :  { %v200_v48 = vpop.f32.mrf.mxu3 }
  0xa3   :  { %v205_v49 = vadd.f32 %v200_v48, %v1434_v47  ;;  %v1461_v35 = vpop.f32.mrf.mxu0 }
  0xa5   :  { %1132 = vtanh.f32 %v205_v49  ;;  %v1063_v15 = vmul.f32 -1.442695, %v205_v49 }
  0xaa   :  { %v187_v50 = vpop.f32.mrf.mxu2  ;;  %v202_v51 = vpop.f32.mrf.mxu3 }
  0xab   :  { %v1133_v52 = vpop.eup %1132  ;;  %v204_v57 = vadd.f32 %v187_v50, %v1441_v56 }
  0xac   :  { %247 = vrot.lane.b32.xlu0 %v1133_v52, %s1312_s18 }
  0xad   :  { %v1062_v58 = vmul.f32 -1.442695, %v204_v57 }
  0xaf   :  { %1134 = vpow2.f32 %v1062_v58 }
  0xb2   :  { %v189_v53 = vpop.f32.mrf.mxu2 }
  0xb5   :  { %v1135_v59 = vpop.eup %1134 }
  0xb6   :  { %v212_v60 = vadd.f32 1.0, %v1135_v59 }
  0xb8   :  { %1136 = vrcp.f32 %v212_v60  ;;  %vm219_vm3 = vweird.f32 %v212_v60  ;;  %v225_v1 = vand.u32 2147483648, %v212_v60  ;;  %v223_v3 = vand.u32 2147483647, %v212_v60 }
  0xba   :  { %v226_v4 = vor.u32 1.1754944e-38, %v225_v1  ;;  %vm224_vm6 = vcmp.eq.f32.partialorder %v223_v3, 8.507059e+37 }
  0xbe   :  { %v1137_v61 = vpop.eup %1136 }
  0xbf   :  { %v215_v62 = vmul.f32 %v1137_v61, %v212_v60  ;;  %vm220_vm4 = vweird.f32 %v1137_v61 }
  0xc0   :  { %vm221_vm5 = vmor %vm219_vm3, %vm220_vm4 }
  0xc1   :  { %v216_v63 = vsub.f32 1.0, %v215_v62 }
  0xc3   :  { %v217_v0 = vmul.f32 %v1137_v61, %v216_v63 }
  0xc5   :  { %v218_v2 = vadd.f32 %v1137_v61, %v217_v0 }
  0xc7   :  { %v222_v6 = vsel %vm221_vm5, %v1137_v61, %v218_v2 }
  0xc8   :  { %v227_v7 = vsel %vm224_vm6, %v226_v4, %v222_v6 }
  0xc9   :  { %v245_v10 = vmul.f32 0.0, %v227_v7 }
 0x11e   :  { %v248_v8 = vpop.permute.xlu0 %247 }
 0x11f   :  { %v250_v9 = vmul.f32 %v248_v8, %v227_v7 }
 0x121   :  { %252 = vrot.lane.b32.xlu0 %v250_v9, %s1312_s18 }
 0x193   :  { %v253_v11 = vpop.permute.xlu0 %252 }
 0x194   :  { %v1445_v13 = vadd.f32 %v253_v11, %v245_v10 }
 0x196   :  { %1138 = vtanh.f32 %v1445_v13  ;;  %v340_v4 = vrot.slane %v1445_v13, 6 }
 0x197   :  { %1140 = vpow2.f32 %v1063_v15 }
 0x19c   :  { %v1139_v14 = vpop.eup %1138 }
 0x19d   :  { %258 = vrot.lane.b32.xlu1 %v1139_v14, %s1312_s18  ;;  %v1141_v16 = vpop.eup %1140 }
 0x19e   :  { %v213_v17 = vadd.f32 1.0, %v1141_v16 }
 0x1a0   :  { %1142 = vrcp.f32 %v213_v17  ;;  %v240_v24 = vand.u32 2147483648, %v213_v17  ;;  %vm234_vm8 = vweird.f32 %v213_v17  ;;  %v238_v25 = vand.u32 2147483647, %v213_v17 }
 0x1a2   :  { %v241_v28 = vor.u32 1.1754944e-38, %v240_v24  ;;  %vm239_vm10 = vcmp.eq.f32.partialorder %v238_v25, 8.507059e+37 }
 0x1a6   :  { %v1143_v18 = vpop.eup %1142 }
 0x1a7   :  { %v230_v19 = vmul.f32 %v1143_v18, %v213_v17  ;;  %vm235_vm7 = vweird.f32 %v1143_v18 }
 0x1a8   :  { %vm236_vm9 = vmor %vm234_vm8, %vm235_vm7 }
 0x1a9   :  { %v231_v20 = vsub.f32 1.0, %v230_v19 }
 0x1ab   :  { %v232_v22 = vmul.f32 %v1143_v18, %v231_v20 }
 0x1ad   :  { %v233_v23 = vadd.f32 %v1143_v18, %v232_v22 }
 0x1af   :  { %v237_v26 = vsel %vm236_vm9, %v1143_v18, %v233_v23 }
 0x1b0   :  { %v242_v30 = vsel %vm239_vm10, %v241_v28, %v237_v26 }
 0x20f   :  { %v259_v29 = vpop.permute.xlu1 %258 }
 0x210   :  { %v261_v31 = vmul.f32 %v259_v29, %v242_v30 }
 0x212   :  { %v262_v32 = vpack.c.bf16 %v261_v31, %v261_v31 }
 0x214   :  { %1064 = vmatmul.msk.bf16.vlgmr.msrb.gmra.mxu0 %vm174_vm11, %v262_v32  ;;  %1065 = vmatmul.msk.bf16.vlgmr.msrb.gmra.mxu1 %vm174_vm11, %v262_v32 }
 0x215   :  { %671 = vmatpush.bf16.msrb.mxu1 %v1358_v5  ;;  %658 = vmatpush.bf16.msrb.mxu0 %v1369_v21 }
 0x219   :  { %672 = vmatpush.bf16.msrb.mxu1 %v1361_v12  ;;  %659 = vmatpush.bf16.msrb.mxu0 %v1381_v33 }
 0x21d   :  { %673 = vmatpush.bf16.msrb.mxu1 %v1372_v27  ;;  %660 = vmatpush.bf16.msrb.mxu0 %v1387_v39 }
 0x221   :  { %674 = vmatpush.bf16.msrb.mxu1 %v1384_v38  ;;  %661 = vmatpush.bf16.msrb.mxu0 %v1393_v42 }
 0x291   :  { %v275_v36 = vpop.f32.mrf.mxu0  ;;  %v288_v37 = vpop.f32.mrf.mxu1 }
 0x292   :  { %v295_v40 = vrot.slane %v288_v37, 6  ;;  %v294_v49 = vrot.slane %v275_v36, 6 }
 0x294   :  { %v299_v41 = vadd.f32 %v295_v40, %v1434_v47  ;;  %v298_v50 = vadd.f32 %v294_v49, %v1441_v56 }
 0x296   :  { %1144 = vtanh.f32 %v299_v41  ;;  %v1066_v51 = vmul.f32 -1.442695, %v298_v50  ;;  %v1067_v10 = vmul.f32 -1.442695, %v299_v41 }
 0x298   :  { %1146 = vpow2.f32 %v1066_v51 }
 0x299   :  { %v277_v43 = vpop.f32.mrf.mxu0  ;;  %v290_v46 = vpop.f32.mrf.mxu1 }
 0x29c   :  { %v1145_v48 = vpop.eup %1144 }
 0x29d   :  { %344 = vrot.lane.b32.xlu1 %v1145_v48, %s1312_s18 }
 0x29e   :  { %v1147_v52 = vpop.eup %1146 }
 0x29f   :  { %v306_v53 = vadd.f32 1.0, %v1147_v52 }
 0x2a1   :  { %1148 = vrcp.f32 %v306_v53  ;;  %v319_v61 = vand.u32 2147483648, %v306_v53  ;;  %vm313_vm13 = vweird.f32 %v306_v53  ;;  %v317_v62 = vand.u32 2147483647, %v306_v53 }
 0x2a3   :  { %v320_v0 = vor.u32 1.1754944e-38, %v319_v61  ;;  %vm318_vm15 = vcmp.eq.f32.partialorder %v317_v62, 8.507059e+37 }
 0x2a7   :  { %v1149_v55 = vpop.eup %1148 }
 0x2a8   :  { %v309_v57 = vmul.f32 %v1149_v55, %v306_v53  ;;  %vm314_vm12 = vweird.f32 %v1149_v55 }
 0x2a9   :  { %vm315_vm14 = vmor %vm313_vm13, %vm314_vm12 }
 0x2aa   :  { %v310_v58 = vsub.f32 1.0, %v309_v57 }
 0x2ac   :  { %v311_v59 = vmul.f32 %v1149_v55, %v310_v58 }
 0x2ae   :  { %v312_v60 = vadd.f32 %v1149_v55, %v311_v59 }
 0x2b0   :  { %v316_v63 = vsel %vm315_vm14, %v1149_v55, %v312_v60 }
 0x2b1   :  { %v321_v2 = vsel %vm318_vm15, %v320_v0, %v316_v63 }
 0x2b2   :  { %v342_v6 = vmul.f32 %v340_v4, %v321_v2 }
 0x30f   :  { %v345_v1 = vpop.permute.xlu1 %344 }
 0x310   :  { %v347_v3 = vmul.f32 %v345_v1, %v321_v2 }
 0x312   :  { %349 = vrot.lane.b32.xlu2 %v347_v3, %s1312_s18 }
 0x36c   :  { %v350_v7 = vpop.permute.xlu2 %349 }
 0x36d   :  { %v1468_v8 = vadd.f32 %v350_v7, %v342_v6 }
 0x36f   :  { %1150 = vtanh.f32 %v1468_v8  ;;  %v439_v1 = vrot.slane %v1468_v8, 6 }
 0x370   :  { %1152 = vpow2.f32 %v1067_v10 }
 0x375   :  { %v1151_v9 = vpop.eup %1150 }
 0x376   :  { %355 = vrot.lane.b32.xlu2 %v1151_v9, %s1312_s18  ;;  %v1153_v11 = vpop.eup %1152 }
 0x377   :  { %v307_v14 = vadd.f32 1.0, %v1153_v11 }
 0x379   :  { %1154 = vrcp.f32 %v307_v14  ;;  %v334_v13 = vand.u32 2147483648, %v307_v14  ;;  %vm328_vm1 = vweird.f32 %v307_v14  ;;  %v332_v20 = vand.u32 2147483647, %v307_v14 }
 0x37b   :  { %v335_v23 = vor.u32 1.1754944e-38, %v334_v13  ;;  %vm333_vm3 = vcmp.eq.f32.partialorder %v332_v20, 8.507059e+37 }
 0x37f   :  { %v1155_v15 = vpop.eup %1154 }
 0x380   :  { %v324_v16 = vmul.f32 %v1155_v15, %v307_v14  ;;  %vm329_vm0 = vweird.f32 %v1155_v15 }
 0x381   :  { %vm330_vm2 = vmor %vm328_vm1, %vm329_vm0 }
 0x382   :  { %v325_v17 = vsub.f32 1.0, %v324_v16 }
 0x384   :  { %v326_v18 = vmul.f32 %v1155_v15, %v325_v17 }
 0x386   :  { %v327_v19 = vadd.f32 %v1155_v15, %v326_v18 }
 0x388   :  { %v331_v22 = vsel %vm330_vm2, %v1155_v15, %v327_v19 }
 0x389   :  { %v336_v24 = vsel %vm333_vm3, %v335_v23, %v331_v22 }
 0x3d0   :  { %v356_v25 = vpop.permute.xlu2 %355 }
 0x3d1   :  { %v358_v26 = vmul.f32 %v356_v25, %v336_v24 }
 0x3d3   :  { %v359_v28 = vpack.c.bf16 %v358_v26, %v358_v26 }
 0x3d5   :  { %v361_v29 = vrot.slane %v359_v28, 1 }
 0x3d7   :  { %1068 = vmatmul.msk.bf16.vlgmr.msrb.gmra.mxu2 %vm174_vm11, %v361_v29  ;;  %1069 = vmatmul.msk.bf16.vlgmr.msrb.gmra.mxu3 %vm174_vm11, %v361_v29 }
 0x3d8   :  { %770 = vmatpush.bf16.msrb.mxu3 %v1358_v5  ;;  %757 = vmatpush.bf16.msrb.mxu2 %v1369_v21 }
 0x3dc   :  { %771 = vmatpush.bf16.msrb.mxu3 %v1361_v12  ;;  %758 = vmatpush.bf16.msrb.mxu2 %v1381_v33 }
 0x3e0   :  { %772 = vmatpush.bf16.msrb.mxu3 %v1372_v27  ;;  %759 = vmatpush.bf16.msrb.mxu2 %v1387_v39 }
 0x3e4   :  { %773 = vmatpush.bf16.msrb.mxu3 %v1384_v38  ;;  %760 = vmatpush.bf16.msrb.mxu2 %v1393_v42 }
 0x45a   :  { %v374_v30 = vpop.f32.mrf.mxu2  ;;  %v387_v31 = vpop.f32.mrf.mxu3 }
 0x45b   :  { %v394_v32 = vrot.slane %v387_v31, 4  ;;  %v393_v43 = vrot.slane %v374_v30, 4 }
 0x45d   :  { %v398_v36 = vadd.f32 %v394_v32, %v1434_v47  ;;  %v397_v46 = vadd.f32 %v393_v43, %v1441_v56 }
 0x45f   :  { %1156 = vtanh.f32 %v398_v36  ;;  %v1070_v48 = vmul.f32 -1.442695, %v397_v46  ;;  %v1071_v7 = vmul.f32 -1.442695, %v398_v36 }
 0x461   :  { %1158 = vpow2.f32 %v1070_v48 }
 0x462   :  { %v376_v37 = vpop.f32.mrf.mxu2  ;;  %v389_v40 = vpop.f32.mrf.mxu3 }
 0x465   :  { %v1157_v41 = vpop.eup %1156 }
 0x466   :  { %443 = vrot.lane.b32.xlu0 %v1157_v41, %s1312_s18 }
 0x467   :  { %v1159_v49 = vpop.eup %1158 }
 0x468   :  { %v405_v50 = vadd.f32 1.0, %v1159_v49 }
 0x46a   :  { %1160 = vrcp.f32 %v405_v50  ;;  %v418_v58 = vand.u32 2147483648, %v405_v50  ;;  %vm412_vm5 = vweird.f32 %v405_v50  ;;  %v416_v59 = vand.u32 2147483647, %v405_v50 }
 0x46c   :  { %v419_v61 = vor.u32 1.1754944e-38, %v418_v58  ;;  %vm417_vm7 = vcmp.eq.f32.partialorder %v416_v59, 8.507059e+37 }
 0x470   :  { %v1161_v51 = vpop.eup %1160 }
 0x471   :  { %v408_v52 = vmul.f32 %v1161_v51, %v405_v50  ;;  %vm413_vm4 = vweird.f32 %v1161_v51 }
 0x472   :  { %vm414_vm6 = vmor %vm412_vm5, %vm413_vm4 }
 0x473   :  { %v409_v53 = vsub.f32 1.0, %v408_v52 }
 0x475   :  { %v410_v55 = vmul.f32 %v1161_v51, %v409_v53 }
 0x477   :  { %v411_v57 = vadd.f32 %v1161_v51, %v410_v55 }
 0x479   :  { %v415_v60 = vsel %vm414_vm6, %v1161_v51, %v411_v57 }
 0x47a   :  { %v420_v62 = vsel %vm417_vm7, %v419_v61, %v415_v60 }
 0x47b   :  { %v441_v2 = vmul.f32 %v439_v1, %v420_v62 }
 0x4d8   :  { %v444_v63 = vpop.permute.xlu0 %443 }
 0x4d9   :  { %v446_v0 = vmul.f32 %v444_v63, %v420_v62 }
 0x4db   :  { %448 = vrot.lane.b32.xlu1 %v446_v0, %s1312_s18 }
 0x54d   :  { %v449_v3 = vpop.permute.xlu1 %448 }
 0x54e   :  { %v1487_v4 = vadd.f32 %v449_v3, %v441_v2 }
 0x550   :  { %1162 = vtanh.f32 %v1487_v4  ;;  %v538_v50 = vrot.slane %v1487_v4, 6 }
 0x551   :  { %1164 = vpow2.f32 %v1071_v7 }
 0x556   :  { %v1163_v6 = vpop.eup %1162 }
 0x557   :  { %454 = vrot.lane.b32.xlu2 %v1163_v6, %s1312_s18  ;;  %v1165_v9 = vpop.eup %1164 }
 0x558   :  { %v406_v10 = vadd.f32 1.0, %v1165_v9 }
 0x55a   :  { %1166 = vrcp.f32 %v406_v10  ;;  %v433_v8 = vand.u32 2147483648, %v406_v10  ;;  %vm427_vm9 = vweird.f32 %v406_v10  ;;  %v431_v18 = vand.u32 2147483647, %v406_v10 }
 0x55c   :  { %v434_v13 = vor.u32 1.1754944e-38, %v433_v8  ;;  %vm432_vm12 = vcmp.eq.f32.partialorder %v431_v18, 8.507059e+37 }
 0x560   :  { %v1167_v11 = vpop.eup %1166 }
 0x561   :  { %v423_v14 = vmul.f32 %v1167_v11, %v406_v10  ;;  %vm428_vm8 = vweird.f32 %v1167_v11 }
 0x562   :  { %vm429_vm10 = vmor %vm427_vm9, %vm428_vm8 }
 0x563   :  { %v424_v15 = vsub.f32 1.0, %v423_v14  ;;  %v1515_v14 = vadd.f32 %v1459_v34, %v74_v45 }
 0x565   :  { %v425_v16 = vmul.f32 %v1167_v11, %v424_v15 }
 0x567   :  { %v426_v17 = vadd.f32 %v1167_v11, %v425_v16 }
 0x569   :  { %v430_v19 = vsel %vm429_vm10, %v1167_v11, %v426_v17 }
 0x56a   :  { %v435_v22 = vsel %vm432_vm12, %v434_v13, %v430_v19  ;;  %v1522_v13 = vadd.f32 %v1461_v35, %v73_v54 }
 0x5b1   :  { %v455_v20 = vpop.permute.xlu2 %454 }
 0x5b2   :  { %v457_v23 = vmul.f32 %v455_v20, %v435_v22 }
 0x5b4   :  { %v458_v24 = vpack.c.bf16 %v457_v23, %v457_v23 }
 0x5b6   :  { %v460_v25 = vrot.slane %v458_v24, 2 }
 0x5b8   :  { %1072 = vmatmul.msk.bf16.vlgmr.msra.gmra.mxu0 %vm174_vm11, %v460_v25  ;;  %1073 = vmatmul.msk.bf16.vlgmr.msra.gmra.mxu1 %vm174_vm11, %v460_v25 }
 0x5b9   :  { %869 = vmatpush.bf16.msra.mxu1 %v1358_v5  ;;  %856 = vmatpush.bf16.msra.mxu0 %v1369_v21 }
 0x5bd   :  { %870 = vmatpush.bf16.msra.mxu1 %v1361_v12  ;;  %857 = vmatpush.bf16.msra.mxu0 %v1381_v33 }
 0x5c1   :  { %871 = vmatpush.bf16.msra.mxu1 %v1372_v27  ;;  %858 = vmatpush.bf16.msra.mxu0 %v1387_v39 }
 0x5c5   :  { %872 = vmatpush.bf16.msra.mxu1 %v1384_v38  ;;  %859 = vmatpush.bf16.msra.mxu0 %v1393_v42 }
 0x635   :  { %v473_v26 = vpop.f32.mrf.mxu0  ;;  %v486_v28 = vpop.f32.mrf.mxu1 }
 0x636   :  { %v493_v29 = vrot.slane %v486_v28, 2  ;;  %v492_v12 = vrot.slane %v473_v26, 2 }
 0x638   :  { %v497_v30 = vadd.f32 %v493_v29, %v1434_v47  ;;  %v496_v27 = vadd.f32 %v492_v12, %v1441_v56 }
 0x63a   :  { %1168 = vtanh.f32 %v497_v30  ;;  %v1074_v33 = vmul.f32 -1.442695, %v496_v27  ;;  %v1075_v57 = vmul.f32 -1.442695, %v497_v30 }
 0x63c   :  { %1170 = vpow2.f32 %v1074_v33 }
 0x63d   :  { %v475_v5 = vpop.f32.mrf.mxu0  ;;  %v488_v21 = vpop.f32.mrf.mxu1 }
 0x640   :  { %v1169_v31 = vpop.eup %1168 }
 0x641   :  { %542 = vrot.lane.b32.xlu0 %v1169_v31, %s1312_s18 }
 0x642   :  { %v1171_v39 = vpop.eup %1170 }
 0x643   :  { %v504_v38 = vadd.f32 1.0, %v1171_v39 }
 0x645   :  { %1172 = vrcp.f32 %v504_v38  ;;  %v517_v47 = vand.u32 2147483648, %v504_v38  ;;  %vm511_vm14 = vweird.f32 %v504_v38  ;;  %v515_v41 = vand.u32 2147483647, %v504_v38 }
 0x647   :  { %v518_v46 = vor.u32 1.1754944e-38, %v517_v47  ;;  %vm516_vm0 = vcmp.eq.f32.partialorder %v515_v41, 8.507059e+37 }
 0x64b   :  { %v1173_v42 = vpop.eup %1172 }
 0x64c   :  { %v507_v32 = vmul.f32 %v1173_v42, %v504_v38  ;;  %vm512_vm13 = vweird.f32 %v1173_v42 }
 0x64d   :  { %vm513_vm15 = vmor %vm511_vm14, %vm512_vm13 }
 0x64e   :  { %v508_v36 = vsub.f32 1.0, %v507_v32 }
 0x650   :  { %v509_v37 = vmul.f32 %v1173_v42, %v508_v36 }
 0x652   :  { %v510_v40 = vadd.f32 %v1173_v42, %v509_v37 }
 0x654   :  { %v514_v43 = vsel %vm513_vm15, %v1173_v42, %v510_v40 }
 0x655   :  { %v519_v56 = vsel %vm516_vm0, %v518_v46, %v514_v43 }
 0x656   :  { %v540_v51 = vmul.f32 %v538_v50, %v519_v56 }
 0x6b3   :  { %v543_v48 = vpop.permute.xlu0 %542 }
 0x6b4   :  { %v545_v49 = vmul.f32 %v543_v48, %v519_v56 }
 0x6b6   :  { %547 = vrot.lane.b32.xlu1 %v545_v49, %s1312_s18 }
 0x728   :  { %v548_v52 = vpop.permute.xlu1 %547 }
 0x729   :  { %v1506_v53 = vadd.f32 %v548_v52, %v540_v51 }
 0x72b   :  { %1174 = vtanh.f32 %v1506_v53  ;;  %v631_v31 = vrot.slane %v1506_v53, 6 }
 0x72c   :  { %1176 = vpow2.f32 %v1075_v57 }
 0x731   :  { %v1175_v55 = vpop.eup %1174 }
 0x732   :  { %553 = vrot.lane.b32.xlu2 %v1175_v55, %s1312_s18  ;;  %v1177_v58 = vpop.eup %1176 }
 0x733   :  { %v505_v59 = vadd.f32 1.0, %v1177_v58 }
 0x735   :  { %1178 = vrcp.f32 %v505_v59  ;;  %v532_v1 = vand.u32 2147483648, %v505_v59  ;;  %vm526_vm2 = vweird.f32 %v505_v59  ;;  %v530_v2 = vand.u32 2147483647, %v505_v59 }
 0x737   :  { %v533_v4 = vor.u32 1.1754944e-38, %v532_v1  ;;  %vm531_vm4 = vcmp.eq.f32.partialorder %v530_v2, 8.507059e+37 }
 0x73b   :  { %v1179_v60 = vpop.eup %1178 }
 0x73c   :  { %v522_v61 = vmul.f32 %v1179_v60, %v505_v59  ;;  %vm527_vm1 = vweird.f32 %v1179_v60 }
 0x73d   :  { %vm528_vm3 = vmor %vm526_vm2, %vm527_vm1 }
 0x73e   :  { %v523_v62 = vsub.f32 1.0, %v522_v61 }
 0x740   :  { %v524_v63 = vmul.f32 %v1179_v60, %v523_v62 }
 0x742   :  { %v525_v0 = vadd.f32 %v1179_v60, %v524_v63 }
 0x744   :  { %v529_v3 = vsel %vm528_vm3, %v1179_v60, %v525_v0 }
 0x745   :  { %v534_v6 = vsel %vm531_vm4, %v533_v4, %v529_v3 }
 0x78c   :  { %v554_v7 = vpop.permute.xlu2 %553 }
 0x78d   :  { %v556_v9 = vmul.f32 %v554_v7, %v534_v6 }
 0x78f   :  { %v557_v10 = vpack.c.bf16 %v556_v9, %v556_v9 }
 0x791   :  { %v559_v11 = vrot.slane %v557_v10, 3 }
 0x793   :  { %1076 = vmatmul.msk.bf16.vlgmr.msra.gmra.mxu2 %vm174_vm11, %v559_v11  ;;  %1077 = vmatmul.msk.bf16.vlgmr.msra.gmra.mxu3 %vm174_vm11, %v559_v11 }
 0x816   :  { %v572_v15 = vpop.f32.mrf.mxu2  ;;  %v585_v16 = vpop.f32.mrf.mxu3 }
 0x817   :  { %v590_v17 = vadd.f32 %v585_v16, %v1515_v14  ;;  %v589_v20 = vadd.f32 %v572_v15, %v1522_v13 }
 0x819   :  { %1180 = vtanh.f32 %v590_v17  ;;  %v1078_v22 = vmul.f32 -1.442695, %v589_v20  ;;  %v1079_v38 = vmul.f32 -1.442695, %v590_v17 }
 0x81b   :  { %1182 = vpow2.f32 %v1078_v22 }
 0x81e   :  { %v574_v8 = vpop.f32.mrf.mxu2  ;;  %v587_v18 = vpop.f32.mrf.mxu3 }
 0x81f   :  { %v1181_v19 = vpop.eup %1180 }
 0x820   :  { %635 = vrot.lane.b32.xlu0 %v1181_v19, %s1312_s18 }
 0x821   :  { %v1183_v45 = vpop.eup %1182 }
 0x822   :  { %v597_v34 = vadd.f32 1.0, %v1183_v45 }
 0x824   :  { %1184 = vrcp.f32 %v597_v34  ;;  %v610_v29 = vand.u32 2147483648, %v597_v34  ;;  %vm604_vm6 = vweird.f32 %v597_v34  ;;  %v608_v30 = vand.u32 2147483647, %v597_v34 }
 0x826   :  { %v611_v54 = vor.u32 1.1754944e-38, %v610_v29  ;;  %vm609_vm8 = vcmp.eq.f32.partialorder %v608_v30, 8.507059e+37 }
 0x82a   :  { %v1185_v23 = vpop.eup %1184 }
 0x82b   :  { %v600_v24 = vmul.f32 %v1185_v23, %v597_v34  ;;  %vm605_vm5 = vweird.f32 %v1185_v23 }
 0x82c   :  { %vm606_vm7 = vmor %vm604_vm6, %vm605_vm5 }
 0x82d   :  { %v601_v25 = vsub.f32 1.0, %v600_v24 }
 0x82f   :  { %v602_v26 = vmul.f32 %v1185_v23, %v601_v25 }
 0x831   :  { %v603_v28 = vadd.f32 %v1185_v23, %v602_v26 }
 0x833   :  { %v607_v44 = vsel %vm606_vm7, %v1185_v23, %v603_v28 }
 0x834   :  { %v612_v35 = vsel %vm609_vm8, %v611_v54, %v607_v44 }
 0x835   :  { %v633_v12 = vmul.f32 %v631_v31, %v612_v35 }
 0x892   :  { %v636_v5 = vpop.permute.xlu0 %635 }
 0x893   :  { %v638_v21 = vmul.f32 %v636_v5, %v612_v35 }
 0x895   :  { %640 = vrot.lane.b32.xlu1 %v638_v21, %s1312_s18 }
 0x907   :  { %v641_v27 = vpop.permute.xlu1 %640 }
 0x908   :  { %v1527_v33 = vadd.f32 %v641_v27, %v633_v12 }
 0x90a   :  { %1186 = vtanh.f32 %v1527_v33  ;;  %v728_v19 = vrot.slane %v1527_v33, 6 }
 0x90b   :  { %1188 = vpow2.f32 %v1079_v38 }
 0x910   :  { %v1187_v39 = vpop.eup %1186 }
 0x911   :  { %646 = vrot.lane.b32.xlu2 %v1187_v39, %s1312_s18  ;;  %v1189_v42 = vpop.eup %1188 }
 0x912   :  { %v598_v32 = vadd.f32 1.0, %v1189_v42 }
 0x914   :  { %1190 = vrcp.f32 %v598_v32  ;;  %v625_v43 = vand.u32 2147483648, %v598_v32  ;;  %vm619_vm10 = vweird.f32 %v598_v32  ;;  %v623_v46 = vand.u32 2147483647, %v598_v32 }
 0x916   :  { %v626_v56 = vor.u32 1.1754944e-38, %v625_v43  ;;  %vm624_vm13 = vcmp.eq.f32.partialorder %v623_v46, 8.507059e+37 }
 0x91a   :  { %v1191_v36 = vpop.eup %1190 }
 0x91b   :  { %v615_v37 = vmul.f32 %v1191_v36, %v598_v32  ;;  %vm620_vm9 = vweird.f32 %v1191_v36 }
 0x91c   :  { %vm621_vm12 = vmor %vm619_vm10, %vm620_vm9 }
 0x91d   :  { %v616_v40 = vsub.f32 1.0, %v615_v37 }
 0x91f   :  { %v617_v47 = vmul.f32 %v1191_v36, %v616_v40 }
 0x921   :  { %v618_v41 = vadd.f32 %v1191_v36, %v617_v47 }
 0x923   :  { %v622_v48 = vsel %vm621_vm12, %v1191_v36, %v618_v41 }
 0x924   :  { %v627_v50 = vsel %vm624_vm13, %v626_v56, %v622_v48 }
 0x96b   :  { %v647_v49 = vpop.permute.xlu2 %646 }
 0x96c   :  { %v649_v51 = vmul.f32 %v647_v49, %v627_v50 }
 0x96e   :  { %v650_v52 = vpack.c.bf16 %v649_v51, %v649_v51 }
 0x970   :  { %1080 = vmatmul.msk.bf16.vlgmr.msrb.gmra.mxu0 %vm174_vm11, %v650_v52  ;;  %1081 = vmatmul.msk.bf16.vlgmr.msrb.gmra.mxu1 %vm174_vm11, %v650_v52 }
 0x9ed   :  { %v663_v53 = vpop.f32.mrf.mxu0  ;;  %v676_v55 = vpop.f32.mrf.mxu1 }
 0x9ee   :  { %v683_v57 = vrot.slane %v676_v55, 6  ;;  %v682_v62 = vrot.slane %v663_v53, 6 }
 0x9f0   :  { %v687_v58 = vadd.f32 %v683_v57, %v1515_v14  ;;  %v686_v63 = vadd.f32 %v682_v62, %v1522_v13 }
 0x9f2   :  { %1192 = vtanh.f32 %v687_v58  ;;  %v1082_v0 = vmul.f32 -1.442695, %v686_v63  ;;  %v1083_v23 = vmul.f32 -1.442695, %v687_v58 }
 0x9f4   :  { %1194 = vpow2.f32 %v1082_v0 }
 0x9f5   :  { %v665_v59 = vpop.f32.mrf.mxu0  ;;  %v678_v60 = vpop.f32.mrf.mxu1 }
 0x9f8   :  { %v1193_v61 = vpop.eup %1192 }
 0x9f9   :  { %732 = vrot.lane.b32.xlu0 %v1193_v61, %s1312_s18 }
 0x9fa   :  { %v1195_v1 = vpop.eup %1194 }
 0x9fb   :  { %v694_v2 = vadd.f32 1.0, %v1195_v1 }
 0x9fd   :  { %1196 = vrcp.f32 %v694_v2  ;;  %v707_v10 = vand.u32 2147483648, %v694_v2  ;;  %vm701_vm15 = vweird.f32 %v694_v2  ;;  %v705_v11 = vand.u32 2147483647, %v694_v2 }
 0x9ff   :  { %v708_v16 = vor.u32 1.1754944e-38, %v707_v10  ;;  %vm706_vm1 = vcmp.eq.f32.partialorder %v705_v11, 8.507059e+37 }
 0xa03   :  { %v1197_v3 = vpop.eup %1196 }
 0xa04   :  { %v697_v4 = vmul.f32 %v1197_v3, %v694_v2  ;;  %vm702_vm14 = vweird.f32 %v1197_v3 }
 0xa05   :  { %vm703_vm0 = vmor %vm701_vm15, %vm702_vm14 }
 0xa06   :  { %v698_v6 = vsub.f32 1.0, %v697_v4 }
 0xa08   :  { %v699_v7 = vmul.f32 %v1197_v3, %v698_v6 }
 0xa0a   :  { %v700_v9 = vadd.f32 %v1197_v3, %v699_v7 }
 0xa0c   :  { %v704_v15 = vsel %vm703_vm0, %v1197_v3, %v700_v9 }
 0xa0d   :  { %v709_v8 = vsel %vm706_vm1, %v708_v16, %v704_v15 }
 0xa0e   :  { %v730_v20 = vmul.f32 %v728_v19, %v709_v8 }
 0xa6b   :  { %v733_v17 = vpop.permute.xlu0 %732 }
 0xa6c   :  { %v735_v18 = vmul.f32 %v733_v17, %v709_v8 }
 0xa6e   :  { %737 = vrot.lane.b32.xlu1 %v735_v18, %s1312_s18 }
 0xae0   :  { %v738_v22 = vpop.permute.xlu1 %737 }
 0xae1   :  { %v1538_v45 = vadd.f32 %v738_v22, %v730_v20 }
 0xae3   :  { %1198 = vtanh.f32 %v1538_v45  ;;  %v827_v63 = vrot.slane %v1538_v45, 6 }
 0xae4   :  { %1200 = vpow2.f32 %v1083_v23 }
 0xae9   :  { %v1199_v34 = vpop.eup %1198 }
 0xaea   :  { %743 = vrot.lane.b32.xlu2 %v1199_v34, %s1312_s18  ;;  %v1201_v24 = vpop.eup %1200 }
 0xaeb   :  { %v695_v25 = vadd.f32 1.0, %v1201_v24 }
 0xaed   :  { %1202 = vrcp.f32 %v695_v25  ;;  %v722_v54 = vand.u32 2147483648, %v695_v25  ;;  %vm716_vm3 = vweird.f32 %v695_v25  ;;  %v720_v35 = vand.u32 2147483647, %v695_v25 }
 0xaef   :  { %v723_v21 = vor.u32 1.1754944e-38, %v722_v54  ;;  %vm721_vm5 = vcmp.eq.f32.partialorder %v720_v35, 8.507059e+37 }
 0xaf3   :  { %v1203_v26 = vpop.eup %1202 }
 0xaf4   :  { %v712_v28 = vmul.f32 %v1203_v26, %v695_v25  ;;  %vm717_vm2 = vweird.f32 %v1203_v26 }
 0xaf5   :  { %vm718_vm4 = vmor %vm716_vm3, %vm717_vm2 }
 0xaf6   :  { %v713_v29 = vsub.f32 1.0, %v712_v28 }
 0xaf8   :  { %v714_v30 = vmul.f32 %v1203_v26, %v713_v29 }
 0xafa   :  { %v715_v44 = vadd.f32 %v1203_v26, %v714_v30 }
 0xafc   :  { %v719_v5 = vsel %vm718_vm4, %v1203_v26, %v715_v44 }
 0xafd   :  { %v724_v31 = vsel %vm721_vm5, %v723_v21, %v719_v5 }
 0xb44   :  { %v744_v12 = vpop.permute.xlu2 %743 }
 0xb45   :  { %v746_v27 = vmul.f32 %v744_v12, %v724_v31 }
 0xb47   :  { %v747_v33 = vpack.c.bf16 %v746_v27, %v746_v27 }
 0xb49   :  { %v749_v39 = vrot.slane %v747_v33, 1 }
 0xb4b   :  { %1084 = vmatmul.msk.bf16.vlgmr.msrb.gmra.mxu2 %vm174_vm11, %v749_v39  ;;  %1085 = vmatmul.msk.bf16.vlgmr.msrb.gmra.mxu3 %vm174_vm11, %v749_v39 }
 0xbce   :  { %v762_v38 = vpop.f32.mrf.mxu2  ;;  %v775_v42 = vpop.f32.mrf.mxu3 }
 0xbcf   :  { %v782_v32 = vrot.slane %v775_v42, 4  ;;  %v781_v41 = vrot.slane %v762_v38, 4 }
 0xbd1   :  { %v786_v36 = vadd.f32 %v782_v32, %v1515_v14  ;;  %v785_v43 = vadd.f32 %v781_v41, %v1522_v13  ;;  %v1121_v41 = vld [vmem:[%s1584_s4 + $0x10] sm:$0xff] }
 0xbd3   :  { %1204 = vtanh.f32 %v786_v36  ;;  %v1086_v46 = vmul.f32 -1.442695, %v785_v43  ;;  %v1087_v4 = vmul.f32 -1.442695, %v786_v36  ;;  %v1120_v43 = vld [vmem:[%s1584_s4 + $0x8] sm:$0xff] }
 0xbd5   :  { %1206 = vpow2.f32 %v1086_v46 }
 0xbd6   :  { %v764_v37 = vpop.f32.mrf.mxu2  ;;  %v777_v40 = vpop.f32.mrf.mxu3 }
 0xbd9   :  { %v1205_v47 = vpop.eup %1204 }
 0xbda   :  { %831 = vrot.lane.b32.xlu0 %v1205_v47, %s1312_s18  ;;  %v1122_v47 = vld [vmem:[%s1584_s4 + $0x18] sm:$0xff] }
 0xbdb   :  { %v1207_v48 = vpop.eup %1206  ;;  %991 = vmatpush.bf16.msra.mxu2 %v1122_v47 }
 0xbdc   :  { %v793_v56 = vadd.f32 1.0, %v1207_v48 }
 0xbde   :  { %1208 = vrcp.f32 %v793_v56  ;;  %v806_v55 = vand.u32 2147483648, %v793_v56  ;;  %vm800_vm7 = vweird.f32 %v793_v56  ;;  %v804_v57 = vand.u32 2147483647, %v793_v56 }
 0xbdf   :  { %992 = vmatpush.bf16.msra.mxu2 %v1121_v41 }
 0xbe0   :  { %v807_v59 = vor.u32 1.1754944e-38, %v806_v55  ;;  %vm805_vm9 = vcmp.eq.f32.partialorder %v804_v57, 8.507059e+37  ;;  %v1119_v55 = vld [vmem:[%s1584_s4] sm:$0xff] }
 0xbe3   :  { %993 = vmatpush.bf16.msra.mxu2 %v1120_v43 }
 0xbe4   :  { %v1209_v49 = vpop.eup %1208 }
 0xbe5   :  { %v796_v50 = vmul.f32 %v1209_v49, %v793_v56  ;;  %vm801_vm6 = vweird.f32 %v1209_v49 }
 0xbe6   :  { %vm802_vm8 = vmor %vm800_vm7, %vm801_vm6  ;;  %vm1000_vm7 = vcmask 33792  }
 0xbe7   :  { %v797_v51 = vsub.f32 1.0, %v796_v50  ;;  %994 = vmatpush.bf16.msra.mxu2 %v1119_v55 }
 0xbe9   :  { %v798_v52 = vmul.f32 %v1209_v49, %v797_v51 }
 0xbeb   :  { %v799_v53 = vadd.f32 %v1209_v49, %v798_v52 }
 0xbed   :  { %v803_v58 = vsel %vm802_vm8, %v1209_v49, %v799_v53 }
 0xbee   :  { %v808_v60 = vsel %vm805_vm9, %v807_v59, %v803_v58 }
 0xbef   :  { %v829_v0 = vmul.f32 %v827_v63, %v808_v60 }
 0xc4c   :  { %v832_v61 = vpop.permute.xlu0 %831 }
 0xc4d   :  { %v834_v62 = vmul.f32 %v832_v61, %v808_v60 }
 0xc4f   :  { %836 = vrot.lane.b32.xlu1 %v834_v62, %s1312_s18 }
 0xcc1   :  { %v837_v1 = vpop.permute.xlu1 %836 }
 0xcc2   :  { %v1549_v2 = vadd.f32 %v837_v1, %v829_v0 }
 0xcc4   :  { %1210 = vtanh.f32 %v1549_v2  ;;  %v926_v46 = vrot.slane %v1549_v2, 6 }
 0xcc5   :  { %1212 = vpow2.f32 %v1087_v4 }
 0xcca   :  { %v1211_v3 = vpop.eup %1210 }
 0xccb   :  { %842 = vrot.lane.b32.xlu2 %v1211_v3, %s1312_s18  ;;  %v1213_v6 = vpop.eup %1212 }
 0xccc   :  { %v794_v7 = vadd.f32 1.0, %v1213_v6 }
 0xcce   :  { %1214 = vrcp.f32 %v794_v7  ;;  %v821_v17 = vand.u32 2147483648, %v794_v7  ;;  %vm815_vm12 = vweird.f32 %v794_v7  ;;  %v819_v8 = vand.u32 2147483647, %v794_v7 }
 0xcd0   :  { %v822_v19 = vor.u32 1.1754944e-38, %v821_v17  ;;  %vm820_vm14 = vcmp.eq.f32.partialorder %v819_v8, 8.507059e+37 }
 0xcd4   :  { %v1215_v9 = vpop.eup %1214 }
 0xcd5   :  { %v811_v10 = vmul.f32 %v1215_v9, %v794_v7  ;;  %vm816_vm10 = vweird.f32 %v1215_v9 }
 0xcd6   :  { %vm817_vm13 = vmor %vm815_vm12, %vm816_vm10 }
 0xcd7   :  { %v812_v11 = vsub.f32 1.0, %v811_v10 }
 0xcd9   :  { %v813_v15 = vmul.f32 %v1215_v9, %v812_v11 }
 0xcdb   :  { %v814_v16 = vadd.f32 %v1215_v9, %v813_v15 }
 0xcdd   :  { %v818_v18 = vsel %vm817_vm13, %v1215_v9, %v814_v16  ;;  %v1131_v9 = vld [vmem:[%s1585_s5] ss:$0 sm:$0xff] }
 0xcde   :  { %v823_v22 = vsel %vm820_vm14, %v822_v19, %v818_v18 }
 0xd25   :  { %v843_v20 = vpop.permute.xlu2 %842 }
 0xd26   :  { %v845_v45 = vmul.f32 %v843_v20, %v823_v22 }
 0xd28   :  { %v846_v34 = vpack.c.bf16 %v845_v45, %v845_v45 }
 0xd2a   :  { %v848_v23 = vrot.slane %v846_v34, 2 }
 0xd2c   :  { %1088 = vmatmul.msk.bf16.vlgmr.msra.gmra.mxu0 %vm174_vm11, %v848_v23  ;;  %1089 = vmatmul.msk.bf16.vlgmr.msra.gmra.mxu1 %vm174_vm11, %v848_v23 }
 0xda9   :  { %v861_v24 = vpop.f32.mrf.mxu0  ;;  %v874_v25 = vpop.f32.mrf.mxu1 }
 0xdaa   :  { %v881_v26 = vrot.slane %v874_v25, 2  ;;  %v880_v54 = vrot.slane %v861_v24, 2 }
 0xdac   :  { %v885_v28 = vadd.f32 %v881_v26, %v1515_v14  ;;  %v884_v35 = vadd.f32 %v880_v54, %v1522_v13 }
 0xdae   :  { %1216 = vtanh.f32 %v885_v28  ;;  %v1090_v5 = vmul.f32 -1.442695, %v884_v35  ;;  %v1091_v51 = vmul.f32 -1.442695, %v885_v28 }
 0xdb0   :  { %1218 = vpow2.f32 %v1090_v5 }
 0xdb1   :  { %v863_v29 = vpop.f32.mrf.mxu0  ;;  %v876_v30 = vpop.f32.mrf.mxu1 }
 0xdb4   :  { %v1217_v44 = vpop.eup %1216 }
 0xdb5   :  { %930 = vrot.lane.b32.xlu0 %v1217_v44, %s1312_s18 }
 0xdb6   :  { %v1219_v21 = vpop.eup %1218 }
 0xdb7   :  { %v892_v31 = vadd.f32 1.0, %v1219_v21 }
 0xdb9   :  { %1220 = vrcp.f32 %v892_v31  ;;  %v905_v14 = vand.u32 2147483648, %v892_v31  ;;  %vm899_vm0 = vweird.f32 %v892_v31  ;;  %v903_v42 = vand.u32 2147483647, %v892_v31 }
 0xdbb   :  { %v906_v36 = vor.u32 1.1754944e-38, %v905_v14  ;;  %vm904_vm2 = vcmp.eq.f32.partialorder %v903_v42, 8.507059e+37 }
 0xdbf   :  { %v1221_v12 = vpop.eup %1220 }
 0xdc0   :  { %v895_v27 = vmul.f32 %v1221_v12, %v892_v31  ;;  %vm900_vm15 = vweird.f32 %v1221_v12 }
 0xdc1   :  { %vm901_vm1 = vmor %vm899_vm0, %vm900_vm15 }
 0xdc2   :  { %v896_v33 = vsub.f32 1.0, %v895_v27 }
 0xdc4   :  { %v897_v39 = vmul.f32 %v1221_v12, %v896_v33 }
 0xdc6   :  { %v898_v38 = vadd.f32 %v1221_v12, %v897_v39 }
 0xdc8   :  { %v902_v32 = vsel %vm901_vm1, %v1221_v12, %v898_v38 }
 0xdc9   :  { %v907_v13 = vsel %vm904_vm2, %v906_v36, %v902_v32 }
 0xdca   :  { %v928_v48 = vmul.f32 %v926_v46, %v907_v13 }
 0xe27   :  { %v931_v37 = vpop.permute.xlu0 %930 }
 0xe28   :  { %v933_v40 = vmul.f32 %v931_v37, %v907_v13 }
 0xe2a   :  { %935 = vrot.lane.b32.xlu1 %v933_v40, %s1312_s18 }
 0xe9c   :  { %v936_v56 = vpop.permute.xlu1 %935 }
 0xe9d   :  { %v938_v49 = vadd.f32 %v936_v56, %v928_v48 }
 0xe9f   :  { %1222 = vtanh.f32 %v938_v49 }
 0xea0   :  { %1224 = vpow2.f32 %v1091_v51 }
 0xea5   :  { %v1223_v50 = vpop.eup %1222 }
 0xea6   :  { %941 = vrot.lane.b32.xlu2 %v1223_v50, %s1312_s18  ;;  %v1225_v52 = vpop.eup %1224 }
 0xea7   :  { %v893_v53 = vadd.f32 1.0, %v1225_v52 }
 0xea9   :  { %1226 = vrcp.f32 %v893_v53  ;;  %v920_v62 = vand.u32 2147483648, %v893_v53  ;;  %vm914_vm4 = vweird.f32 %v893_v53  ;;  %v918_v63 = vand.u32 2147483647, %v893_v53 }
 0xeab   :  { %v921_v1 = vor.u32 1.1754944e-38, %v920_v62  ;;  %vm919_vm6 = vcmp.eq.f32.partialorder %v918_v63, 8.507059e+37 }
 0xeaf   :  { %v1227_v57 = vpop.eup %1226 }
 0xeb0   :  { %v910_v58 = vmul.f32 %v1227_v57, %v893_v53  ;;  %vm915_vm3 = vweird.f32 %v1227_v57 }
 0xeb1   :  { %vm916_vm5 = vmor %vm914_vm4, %vm915_vm3 }
 0xeb2   :  { %v911_v59 = vsub.f32 1.0, %v910_v58 }
 0xeb4   :  { %v912_v60 = vmul.f32 %v1227_v57, %v911_v59 }
 0xeb6   :  { %v913_v61 = vadd.f32 %v1227_v57, %v912_v60 }
 0xeb8   :  { %v917_v0 = vsel %vm916_vm5, %v1227_v57, %v913_v61 }
 0xeb9   :  { %v922_v2 = vsel %vm919_vm6, %v921_v1, %v917_v0 }
 0xf00   :  { %v942_v3 = vpop.permute.xlu2 %941 }
 0xf01   :  { %v944_v4 = vmul.f32 %v942_v3, %v922_v2 }
 0xf03   :  { %v945_v6 = vpack.c.bf16 %v944_v4, %v944_v4 }
 0xf05   :  { %v959_v7 = vrot.slane %v945_v6, 3 }
 0xf07   :  { %1108 = vmatmul.msk.bf16.vlgmr.msra.gmra.mxu2 %vm174_vm11, %v959_v7 }
 0xf8a   :  { %v996_v10 = vpop.f32.mrf.mxu2 }
 0xf8b   :  { %v997_v11 = vadd.f32 %v1131_v9, %v996_v10 }
 0xf8d   :  { %1001 = vst.msk [vmem:[#allocation7] sm:$0x3] %vm1000_vm7, %v997_v11 }
 0xf8e   :  { %1012 = dma.vmem_to_hbm [thread:$0]  %s1008_s28, 32, %s1010_s7, [#allocation4]  }
 0xf92   :  { %v998_v15 = vpop.f32.mrf.mxu2 }
 0xf93   :  { %1304 = dma.done.wait [#allocation4], 32  }
 0xf94   :  { %1305 = vsyncadd [#allocation4], 4294967264 }
 0xf95   :  { %1017 = vsyncpa [#allocation3], 1 }
 0xf96   :  { %1018 = vsyncpa [#allocation6], 1 }
 0xf97   :  { %1019 = vsyncpa [#allocation4], 1 }

</bundles_post_ra>
